<compile_context>
chip_gen: v7x
topology: tpu7x:2x2x1
jax: 0.10.0
libtpu: 0.0.40
codegen_flags: <defaults>
</compile_context>

<pallas_src>
import functools
import math

import jax
import jax.numpy as jnp
from jax.experimental import pallas as pl
from jax.experimental.pallas import tpu as pltpu


LANE = 128


def _round_up(x, m):
    return ((x + m - 1) // m) * m


def _pad2(a, rows, cols):
    """Zero-pad a 2-D array up to (rows, cols)."""
    a = a.astype(jnp.float32)
    return jnp.zeros((rows, cols), jnp.float32).at[:a.shape[0], :a.shape[1]].set(a)


# ----------------------------------------------------------------------------
# Pallas kernel: one GINEConv layer (+ folded BNs, optional trailing ReLU) for
# one tile of TILE_DST destination nodes.
# ----------------------------------------------------------------------------
def gine_layer_kernel(aw_ref, hs_ref, hd_ref, we_ref, be_ref,
                      w1_ref, b1_ref, w2_ref, b2_ref, out_ref,
                      *, eps, relu_out):
    tile_dst = out_ref.shape[0]           # dst nodes handled by this grid step
    n_src = aw_ref.shape[0]               # all (padded) source nodes
    f_in = hs_ref.shape[2]

    we = we_ref[...]                      # [1, F]  edge Linear weight (edge_dim=1)
    be = be_ref[...]                      # [1, F]  edge Linear bias

    # Aggregate relu(x_src + Linear(edge_weight)) over incoming edges.
    # src is the LEADING loop axis -> accumulation is plain VALU adds (no XLU
    # cross-sublane reduce) and only one [TILE_DST, F] slab is live per step.
    def src_step(s, agg):
        a_col = aw_ref[s]                                   # [TILE_DST, 1] f32
        awb = jnp.broadcast_to(a_col, (tile_dst, f_in))     # single lane broadcast
        msg = jnp.maximum(hs_ref[s] + awb * we + be, 0.0)   # [TILE_DST, F]
        return agg + jnp.where(awb != 0.0, msg, 0.0)        # mask reuses awb

    agg = jax.lax.fori_loop(
        0, n_src, src_step,
        jnp.zeros((tile_dst, f_in), jnp.float32), unroll=True)

    # GINE residual: aggregate + (1 + eps) * x_dst
    z = agg + (1.0 + eps) * hd_ref[...]

    # MLP: Linear -> BN(eval, folded into w1/b1) -> ReLU -> Linear
    # (outer GIN_Net BN folded into w2/b2).  bf16 MXU operands, f32 accumulation.
    z1 = jnp.dot(z.astype(jnp.bfloat16), w1_ref[...],
                 preferred_element_type=jnp.float32) + b1_ref[...]
    z1 = jnp.maximum(z1, 0.0)
    z2 = jnp.dot(z1.astype(jnp.bfloat16), w2_ref[...],
                 preferred_element_type=jnp.float32) + b2_ref[...]
    out_ref[...] = jnp.maximum(z2, 0.0) if relu_out else z2


def _gine_layer(aw3, h, fl, *, relu_out, tile_dst):
    """One GINEConv layer as a dst-tiled pallas_call."""
    n_pad, f_in = h.shape
    h_pad = fl["w1"].shape[1]
    f_out = fl["w2"].shape[1]
    grid = (n_pad // tile_dst,)

    kernel = functools.partial(gine_layer_kernel, eps=fl["eps"], relu_out=relu_out)
    return pl.pallas_call(
        kernel,
        out_shape=jax.ShapeDtypeStruct((n_pad, f_out), jnp.float32),
        grid=grid,
        in_specs=[
            # A_w[src, dst, 1]: dst-tiled, src resident on the leading axis
            pl.BlockSpec((n_pad, tile_dst, 1), lambda d: (0, d, 0)),
            # source-node features, resident, leading-axis indexable
            pl.BlockSpec((n_pad, 1, f_in), lambda d: (0, 0, 0)),
            # destination-node features for the (1+eps)*x residual, dst-tiled
            pl.BlockSpec((tile_dst, f_in), lambda d: (d, 0)),
            pl.BlockSpec((1, f_in), lambda d: (0, 0)),       # we
            pl.BlockSpec((1, f_in), lambda d: (0, 0)),       # be
            pl.BlockSpec((f_in, h_pad), lambda d: (0, 0)),   # w1 (bf16)
            pl.BlockSpec((1, h_pad), lambda d: (0, 0)),      # b1
            pl.BlockSpec((h_pad, f_out), lambda d: (0, 0)),  # w2 (bf16)
            pl.BlockSpec((1, f_out), lambda d: (0, 0)),      # b2
        ],
        out_specs=pl.BlockSpec((tile_dst, f_out), lambda d: (d, 0)),
        compiler_params=pltpu.CompilerParams(
            dimension_semantics=("parallel",),               # v7x: 2 TCs split dst tiles
            vmem_limit_bytes=32 * 1024 * 1024),              # fits v7x's 64 MiB VMEM
    )(aw3, h[:, None, :], h,
      fl["we"], fl["be"], fl["w1"], fl["b1"], fl["w2"], fl["b2"])


# ----------------------------------------------------------------------------
# Glue: gcn_norm (add remaining self loops + D^-1/2 A D^-1/2), densified [src, dst]
# ----------------------------------------------------------------------------
def gcn_norm_dense_sd(edge_index, edge_weight, num_nodes):
    src, dst = edge_index[0], edge_index[1]
    w = edge_weight.astype(jnp.float32)
    # add_remaining_self_loops(fill_value=1.): only nodes WITHOUT a self loop get one
    has_loop = jnp.zeros((num_nodes,), jnp.float32).at[src].add(
        jnp.where(src == dst, 1.0, 0.0))
    loop_w = jnp.where(has_loop > 0.0, 0.0, 1.0)
    loop = jnp.arange(num_nodes)
    s_all = jnp.concatenate([src, loop])
    d_all = jnp.concatenate([dst, loop])
    w_all = jnp.concatenate([w, loop_w])
    deg = jnp.zeros((num_nodes,), jnp.float32).at[d_all].add(w_all)
    dinv = jnp.where(deg > 0.0, jax.lax.rsqrt(deg), 0.0)
    wn = dinv[s_all] * w_all * dinv[d_all]
    # keep real edges non-zero so the in-kernel (A_w != 0) mask stays exact
    wn = jnp.where((w_all != 0.0) & (wn == 0.0), 1e-30, wn)
    # duplicate (src, dst) pairs sum their normalized weights (dense-A limitation)
    return jnp.zeros((num_nodes, num_nodes), jnp.float32).at[s_all, d_all].add(wn)


# ----------------------------------------------------------------------------
# Deterministic parameter init (shapes from GIN_Net.__init__), eval-mode BN stats
# ----------------------------------------------------------------------------
def init_params(key, in_feats, out_feats):
    hidden = 2 * in_feats

    def lin(k, fan_in, fan_out):  # pre-transposed: [fan_in, fan_out]
        return (jax.random.normal(k, (fan_in, fan_out), jnp.float32)
                * (1.0 / math.sqrt(fan_in)))

    def bn(n):  # freshly-initialized BatchNorm1d, eval mode
        return dict(gamma=jnp.ones((1, n), jnp.float32),
                    beta=jnp.zeros((1, n), jnp.float32),
                    mean=jnp.zeros((1, n), jnp.float32),
                    var=jnp.ones((1, n), jnp.float32))

    ks = jax.random.split(key, 6)
    layer1 = dict(
        eps=0.0,                                             # train_eps=True init
        we=lin(ks[0], 1, in_feats), be=jnp.zeros((1, in_feats), jnp.float32),
        w1=lin(ks[1], in_feats, hidden), b1=jnp.zeros((1, hidden), jnp.float32),
        bn1=bn(hidden),                                      # MLP inner BatchNorm
        w2=lin(ks[2], hidden, in_feats), b2=jnp.zeros((1, in_feats), jnp.float32),
        bn_post=bn(in_feats),                                # GIN_Net outer BatchNorm
    )
    layer2 = dict(
        eps=0.0,
        we=lin(ks[3], 1, in_feats), be=jnp.zeros((1, in_feats), jnp.float32),
        w1=lin(ks[4], in_feats, hidden), b1=jnp.zeros((1, hidden), jnp.float32),
        bn1=bn(hidden),
        w2=lin(ks[5], hidden, out_feats), b2=jnp.zeros((1, out_feats), jnp.float32),
        bn_post=None,                                        # no BN after last layer
    )
    return layer1, layer2


def fold_and_pad_layer(p, fp_in, hp, fp_out):
    """Fold eval-mode BatchNorms into the Linears, pad to lane width, bf16 weights."""
    b = p["bn1"]
    s1 = b["gamma"] * jax.lax.rsqrt(b["var"] + 1e-5)
    t1 = b["beta"] - b["mean"] * s1
    w1 = p["w1"] * s1                       # column-wise scale
    b1 = p["b1"] * s1 + t1
    w2, b2 = p["w2"], p["b2"]
    if p["bn_post"] is not None:            # outer GIN_Net BN (ReLU stays in-kernel)
        bp = p["bn_post"]
        sp = bp["gamma"] * jax.lax.rsqrt(bp["var"] + 1e-5)
        tp = bp["beta"] - bp["mean"] * sp
        w2 = w2 * sp
        b2 = b2 * sp + tp
    return dict(
        eps=float(p["eps"]),
        we=_pad2(p["we"], 1, fp_in), be=_pad2(p["be"], 1, fp_in),
        w1=_pad2(w1, fp_in, hp).astype(jnp.bfloat16), b1=_pad2(b1, 1, hp),
        w2=_pad2(w2, hp, fp_out).astype(jnp.bfloat16), b2=_pad2(b2, 1, fp_out),
    )


# ----------------------------------------------------------------------------
# GIN_Net forward (depth = 2): two dst-tiled pallas_calls of the shared layer kernel
# ----------------------------------------------------------------------------
def gin_net_forward(x, edge_index, edge_weight, params, *, tile_dst=8):
    assert tile_dst % 8 == 0
    n, in_feats = x.shape
    l1, l2 = params
    hidden = l1["w1"].shape[1]
    out_feats = l2["w2"].shape[1]

    fp = _round_up(in_feats, LANE)          # 32  -> 128
    hp = _round_up(hidden, LANE)            # 64  -> 128
    op = _round_up(out_feats, LANE)         # 16  -> 128 (lane-dense output store)
    n_pad = _round_up(n, tile_dst)

    f1 = fold_and_pad_layer(l1, fp, hp, fp)
    f2 = fold_and_pad_layer(l2, fp, hp, op)

    a_sd = gcn_norm_dense_sd(edge_index, edge_weight, n)     # [n, n]  A[src, dst]
    a_sd = jnp.zeros((n_pad, n_pad), jnp.float32).at[:n, :n].set(a_sd)
    aw3 = a_sd[:, :, None]                                    # [n_pad, n_pad, 1]

    h = _pad2(x, n_pad, fp)

    # layer 1: GINEConv -> BN(folded) -> ReLU -> Dropout(eval = identity)
    h1 = _gine_layer(aw3, h, f1, relu_out=True, tile_dst=tile_dst)
    # layer 2: final GINEConv only
    out = _gine_layer(aw3, h1, f2, relu_out=False, tile_dst=tile_dst)
    return out[:n, :out_feats]


if __name__ == "__main__":
    N, IN_FEATS, OUT_FEATS = 16, 32, 16

    key = jax.random.PRNGKey(0)
    k_param, k_w, k_x = jax.random.split(key, 3)

    # deterministic bidirectional ring graph (no duplicate edges, no self loops)
    idx = jnp.arange(N)
    src = jnp.concatenate([idx, (idx + 1) % N])
    dst = jnp.concatenate([(idx + 1) % N, idx])
    edge_index = jnp.stack([src, dst]).astype(jnp.int32)        # [2, 2N]
    edge_weight = jax.random.uniform(k_w, (2 * N,), jnp.float32, 0.5, 1.5)
    x = jax.random.normal(k_x, (N, IN_FEATS), jnp.float32)

    params = init_params(k_param, IN_FEATS, OUT_FEATS)

    out = gin_net_forward(x, edge_index, edge_weight, params, tile_dst=8)
    out = jax.block_until_ready(out)
    assert out.shape == (N, OUT_FEATS)
    print("KERNEL_OK")
</pallas_src>

<mosaic_0001>
module attributes {stable_mosaic.version = 11 : i64} {
  func.func @gine_layer_kernel(%arg0: i32, %arg1: memref<16x8x1xf32, #tpu.memory_space<vmem>>, %arg2: memref<16x1x128xf32, #tpu.memory_space<vmem>>, %arg3: memref<8x128xf32, #tpu.memory_space<vmem>>, %arg4: memref<1x128xf32, #tpu.memory_space<vmem>>, %arg5: memref<1x128xf32, #tpu.memory_space<vmem>>, %arg6: memref<128x128xbf16, #tpu.memory_space<vmem>>, %arg7: memref<1x128xf32, #tpu.memory_space<vmem>>, %arg8: memref<128x128xbf16, #tpu.memory_space<vmem>>, %arg9: memref<1x128xf32, #tpu.memory_space<vmem>>, %arg10: memref<8x128xf32, #tpu.memory_space<vmem>>) attributes {dimension_semantics = [#tpu.dimension_semantics<parallel>], iteration_bounds = array<i64: 2>, scalar_prefetch = 0 : i64, scratch_operands = 0 : i64, tpu.core_type = #tpu.core_type<tc>, window_params = [{transform_indices = @transform_0, window_bounds = array<i64: 16, 8, 1>}, {pipeline_mode = #tpu.pipeline_mode<synchronous>, transform_indices = @transform_1, window_bounds = array<i64: 16, 1, 128>}, {transform_indices = @transform_2, window_bounds = array<i64: 8, 128>}, {pipeline_mode = #tpu.pipeline_mode<synchronous>, transform_indices = @transform_3, window_bounds = array<i64: 1, 128>}, {pipeline_mode = #tpu.pipeline_mode<synchronous>, transform_indices = @transform_4, window_bounds = array<i64: 1, 128>}, {pipeline_mode = #tpu.pipeline_mode<synchronous>, transform_indices = @transform_5, window_bounds = array<i64: 128, 128>}, {pipeline_mode = #tpu.pipeline_mode<synchronous>, transform_indices = @transform_6, window_bounds = array<i64: 1, 128>}, {pipeline_mode = #tpu.pipeline_mode<synchronous>, transform_indices = @transform_7, window_bounds = array<i64: 128, 128>}, {pipeline_mode = #tpu.pipeline_mode<synchronous>, transform_indices = @transform_8, window_bounds = array<i64: 1, 128>}, {transform_indices = @transform_9, window_bounds = array<i64: 8, 128>}]} {
    %c0 = arith.constant 0 : index
    %c0_0 = arith.constant 0 : index
    %0 = vector.load %arg4[%c0, %c0_0] : memref<1x128xf32, #tpu.memory_space<vmem>>, vector<1x128xf32>
    %c0_1 = arith.constant 0 : index
    %c0_2 = arith.constant 0 : index
    %1 = vector.load %arg5[%c0_1, %c0_2] : memref<1x128xf32, #tpu.memory_space<vmem>>, vector<1x128xf32>
    %cst = arith.constant 0.000000e+00 : f32
    %2 = vector.broadcast %cst : f32 to vector<8x128xf32>
    %c0_i32 = arith.constant 0 : i32
    %3 = arith.index_cast %c0_i32 : i32 to index
    %c0_3 = arith.constant 0 : index
    %c0_4 = arith.constant 0 : index
    %4 = vector.load %arg1[%3, %c0_3, %c0_4] : memref<16x8x1xf32, #tpu.memory_space<vmem>>, vector<1x8x1xf32>
    %5 = vector.shape_cast %4 : vector<1x8x1xf32> to vector<8x1xf32>
    %6 = vector.shape_cast %5 : vector<8x1xf32> to vector<8x1xf32>
    %7 = vector.broadcast %6 : vector<8x1xf32> to vector<8x128xf32>
    %8 = arith.index_cast %c0_i32 : i32 to index
    %c0_5 = arith.constant 0 : index
    %c0_6 = arith.constant 0 : index
    %9 = vector.load %arg2[%8, %c0_5, %c0_6] : memref<16x1x128xf32, #tpu.memory_space<vmem>>, vector<1x1x128xf32>
    %10 = vector.shape_cast %9 : vector<1x1x128xf32> to vector<1x128xf32>
    %11 = vector.broadcast %0 : vector<1x128xf32> to vector<8x128xf32>
    %12 = arith.mulf %7, %11 : vector<8x128xf32>
    %13 = vector.broadcast %10 : vector<1x128xf32> to vector<8x128xf32>
    %14 = arith.addf %13, %12 : vector<8x128xf32>
    %15 = vector.broadcast %1 : vector<1x128xf32> to vector<8x128xf32>
    %16 = arith.addf %14, %15 : vector<8x128xf32>
    %cst_7 = arith.constant 0.000000e+00 : f32
    %17 = vector.broadcast %cst_7 : f32 to vector<8x128xf32>
    %18 = arith.maximumf %16, %17 : vector<8x128xf32>
    %cst_8 = arith.constant 0.000000e+00 : f32
    %19 = vector.broadcast %cst_8 : f32 to vector<8x128xf32>
    %20 = arith.cmpf one, %7, %19 : vector<8x128xf32>
    %cst_9 = arith.constant 0.000000e+00 : f32
    %21 = vector.broadcast %cst_9 : f32 to vector<8x128xf32>
    %22 = arith.select %20, %18, %21 : vector<8x128xi1>, vector<8x128xf32>
    %23 = arith.addf %2, %22 : vector<8x128xf32>
    %c1_i32 = arith.constant 1 : i32
    %24 = arith.index_cast %c1_i32 : i32 to index
    %c0_10 = arith.constant 0 : index
    %c0_11 = arith.constant 0 : index
    %25 = vector.load %arg1[%24, %c0_10, %c0_11] : memref<16x8x1xf32, #tpu.memory_space<vmem>>, vector<1x8x1xf32>
    %26 = vector.shape_cast %25 : vector<1x8x1xf32> to vector<8x1xf32>
    %27 = vector.shape_cast %26 : vector<8x1xf32> to vector<8x1xf32>
    %28 = vector.broadcast %27 : vector<8x1xf32> to vector<8x128xf32>
    %29 = arith.index_cast %c1_i32 : i32 to index
    %c0_12 = arith.constant 0 : index
    %c0_13 = arith.constant 0 : index
    %30 = vector.load %arg2[%29, %c0_12, %c0_13] : memref<16x1x128xf32, #tpu.memory_space<vmem>>, vector<1x1x128xf32>
    %31 = vector.shape_cast %30 : vector<1x1x128xf32> to vector<1x128xf32>
    %32 = vector.broadcast %0 : vector<1x128xf32> to vector<8x128xf32>
    %33 = arith.mulf %28, %32 : vector<8x128xf32>
    %34 = vector.broadcast %31 : vector<1x128xf32> to vector<8x128xf32>
    %35 = arith.addf %34, %33 : vector<8x128xf32>
    %36 = vector.broadcast %1 : vector<1x128xf32> to vector<8x128xf32>
    %37 = arith.addf %35, %36 : vector<8x128xf32>
    %cst_14 = arith.constant 0.000000e+00 : f32
    %38 = vector.broadcast %cst_14 : f32 to vector<8x128xf32>
    %39 = arith.maximumf %37, %38 : vector<8x128xf32>
    %cst_15 = arith.constant 0.000000e+00 : f32
    %40 = vector.broadcast %cst_15 : f32 to vector<8x128xf32>
    %41 = arith.cmpf one, %28, %40 : vector<8x128xf32>
    %cst_16 = arith.constant 0.000000e+00 : f32
    %42 = vector.broadcast %cst_16 : f32 to vector<8x128xf32>
    %43 = arith.select %41, %39, %42 : vector<8x128xi1>, vector<8x128xf32>
    %44 = arith.addf %23, %43 : vector<8x128xf32>
    %c2_i32 = arith.constant 2 : i32
    %45 = arith.index_cast %c2_i32 : i32 to index
    %c0_17 = arith.constant 0 : index
    %c0_18 = arith.constant 0 : index
    %46 = vector.load %arg1[%45, %c0_17, %c0_18] : memref<16x8x1xf32, #tpu.memory_space<vmem>>, vector<1x8x1xf32>
    %47 = vector.shape_cast %46 : vector<1x8x1xf32> to vector<8x1xf32>
    %48 = vector.shape_cast %47 : vector<8x1xf32> to vector<8x1xf32>
    %49 = vector.broadcast %48 : vector<8x1xf32> to vector<8x128xf32>
    %50 = arith.index_cast %c2_i32 : i32 to index
    %c0_19 = arith.constant 0 : index
    %c0_20 = arith.constant 0 : index
    %51 = vector.load %arg2[%50, %c0_19, %c0_20] : memref<16x1x128xf32, #tpu.memory_space<vmem>>, vector<1x1x128xf32>
    %52 = vector.shape_cast %51 : vector<1x1x128xf32> to vector<1x128xf32>
    %53 = vector.broadcast %0 : vector<1x128xf32> to vector<8x128xf32>
    %54 = arith.mulf %49, %53 : vector<8x128xf32>
    %55 = vector.broadcast %52 : vector<1x128xf32> to vector<8x128xf32>
    %56 = arith.addf %55, %54 : vector<8x128xf32>
    %57 = vector.broadcast %1 : vector<1x128xf32> to vector<8x128xf32>
    %58 = arith.addf %56, %57 : vector<8x128xf32>
    %cst_21 = arith.constant 0.000000e+00 : f32
    %59 = vector.broadcast %cst_21 : f32 to vector<8x128xf32>
    %60 = arith.maximumf %58, %59 : vector<8x128xf32>
    %cst_22 = arith.constant 0.000000e+00 : f32
    %61 = vector.broadcast %cst_22 : f32 to vector<8x128xf32>
    %62 = arith.cmpf one, %49, %61 : vector<8x128xf32>
    %cst_23 = arith.constant 0.000000e+00 : f32
    %63 = vector.broadcast %cst_23 : f32 to vector<8x128xf32>
    %64 = arith.select %62, %60, %63 : vector<8x128xi1>, vector<8x128xf32>
    %65 = arith.addf %44, %64 : vector<8x128xf32>
    %c3_i32 = arith.constant 3 : i32
    %66 = arith.index_cast %c3_i32 : i32 to index
    %c0_24 = arith.constant 0 : index
    %c0_25 = arith.constant 0 : index
    %67 = vector.load %arg1[%66, %c0_24, %c0_25] : memref<16x8x1xf32, #tpu.memory_space<vmem>>, vector<1x8x1xf32>
    %68 = vector.shape_cast %67 : vector<1x8x1xf32> to vector<8x1xf32>
    %69 = vector.shape_cast %68 : vector<8x1xf32> to vector<8x1xf32>
    %70 = vector.broadcast %69 : vector<8x1xf32> to vector<8x128xf32>
    %71 = arith.index_cast %c3_i32 : i32 to index
    %c0_26 = arith.constant 0 : index
    %c0_27 = arith.constant 0 : index
    %72 = vector.load %arg2[%71, %c0_26, %c0_27] : memref<16x1x128xf32, #tpu.memory_space<vmem>>, vector<1x1x128xf32>
    %73 = vector.shape_cast %72 : vector<1x1x128xf32> to vector<1x128xf32>
    %74 = vector.broadcast %0 : vector<1x128xf32> to vector<8x128xf32>
    %75 = arith.mulf %70, %74 : vector<8x128xf32>
    %76 = vector.broadcast %73 : vector<1x128xf32> to vector<8x128xf32>
    %77 = arith.addf %76, %75 : vector<8x128xf32>
    %78 = vector.broadcast %1 : vector<1x128xf32> to vector<8x128xf32>
    %79 = arith.addf %77, %78 : vector<8x128xf32>
    %cst_28 = arith.constant 0.000000e+00 : f32
    %80 = vector.broadcast %cst_28 : f32 to vector<8x128xf32>
    %81 = arith.maximumf %79, %80 : vector<8x128xf32>
    %cst_29 = arith.constant 0.000000e+00 : f32
    %82 = vector.broadcast %cst_29 : f32 to vector<8x128xf32>
    %83 = arith.cmpf one, %70, %82 : vector<8x128xf32>
    %cst_30 = arith.constant 0.000000e+00 : f32
    %84 = vector.broadcast %cst_30 : f32 to vector<8x128xf32>
    %85 = arith.select %83, %81, %84 : vector<8x128xi1>, vector<8x128xf32>
    %86 = arith.addf %65, %85 : vector<8x128xf32>
    %c4_i32 = arith.constant 4 : i32
    %87 = arith.index_cast %c4_i32 : i32 to index
    %c0_31 = arith.constant 0 : index
    %c0_32 = arith.constant 0 : index
    %88 = vector.load %arg1[%87, %c0_31, %c0_32] : memref<16x8x1xf32, #tpu.memory_space<vmem>>, vector<1x8x1xf32>
    %89 = vector.shape_cast %88 : vector<1x8x1xf32> to vector<8x1xf32>
    %90 = vector.shape_cast %89 : vector<8x1xf32> to vector<8x1xf32>
    %91 = vector.broadcast %90 : vector<8x1xf32> to vector<8x128xf32>
    %92 = arith.index_cast %c4_i32 : i32 to index
    %c0_33 = arith.constant 0 : index
    %c0_34 = arith.constant 0 : index
    %93 = vector.load %arg2[%92, %c0_33, %c0_34] : memref<16x1x128xf32, #tpu.memory_space<vmem>>, vector<1x1x128xf32>
    %94 = vector.shape_cast %93 : vector<1x1x128xf32> to vector<1x128xf32>
    %95 = vector.broadcast %0 : vector<1x128xf32> to vector<8x128xf32>
    %96 = arith.mulf %91, %95 : vector<8x128xf32>
    %97 = vector.broadcast %94 : vector<1x128xf32> to vector<8x128xf32>
    %98 = arith.addf %97, %96 : vector<8x128xf32>
    %99 = vector.broadcast %1 : vector<1x128xf32> to vector<8x128xf32>
    %100 = arith.addf %98, %99 : vector<8x128xf32>
    %cst_35 = arith.constant 0.000000e+00 : f32
    %101 = vector.broadcast %cst_35 : f32 to vector<8x128xf32>
    %102 = arith.maximumf %100, %101 : vector<8x128xf32>
    %cst_36 = arith.constant 0.000000e+00 : f32
    %103 = vector.broadcast %cst_36 : f32 to vector<8x128xf32>
    %104 = arith.cmpf one, %91, %103 : vector<8x128xf32>
    %cst_37 = arith.constant 0.000000e+00 : f32
    %105 = vector.broadcast %cst_37 : f32 to vector<8x128xf32>
    %106 = arith.select %104, %102, %105 : vector<8x128xi1>, vector<8x128xf32>
    %107 = arith.addf %86, %106 : vector<8x128xf32>
    %c5_i32 = arith.constant 5 : i32
    %108 = arith.index_cast %c5_i32 : i32 to index
    %c0_38 = arith.constant 0 : index
    %c0_39 = arith.constant 0 : index
    %109 = vector.load %arg1[%108, %c0_38, %c0_39] : memref<16x8x1xf32, #tpu.memory_space<vmem>>, vector<1x8x1xf32>
    %110 = vector.shape_cast %109 : vector<1x8x1xf32> to vector<8x1xf32>
    %111 = vector.shape_cast %110 : vector<8x1xf32> to vector<8x1xf32>
    %112 = vector.broadcast %111 : vector<8x1xf32> to vector<8x128xf32>
    %113 = arith.index_cast %c5_i32 : i32 to index
    %c0_40 = arith.constant 0 : index
    %c0_41 = arith.constant 0 : index
    %114 = vector.load %arg2[%113, %c0_40, %c0_41] : memref<16x1x128xf32, #tpu.memory_space<vmem>>, vector<1x1x128xf32>
    %115 = vector.shape_cast %114 : vector<1x1x128xf32> to vector<1x128xf32>
    %116 = vector.broadcast %0 : vector<1x128xf32> to vector<8x128xf32>
    %117 = arith.mulf %112, %116 : vector<8x128xf32>
    %118 = vector.broadcast %115 : vector<1x128xf32> to vector<8x128xf32>
    %119 = arith.addf %118, %117 : vector<8x128xf32>
    %120 = vector.broadcast %1 : vector<1x128xf32> to vector<8x128xf32>
    %121 = arith.addf %119, %120 : vector<8x128xf32>
    %cst_42 = arith.constant 0.000000e+00 : f32
    %122 = vector.broadcast %cst_42 : f32 to vector<8x128xf32>
    %123 = arith.maximumf %121, %122 : vector<8x128xf32>
    %cst_43 = arith.constant 0.000000e+00 : f32
    %124 = vector.broadcast %cst_43 : f32 to vector<8x128xf32>
    %125 = arith.cmpf one, %112, %124 : vector<8x128xf32>
    %cst_44 = arith.constant 0.000000e+00 : f32
    %126 = vector.broadcast %cst_44 : f32 to vector<8x128xf32>
    %127 = arith.select %125, %123, %126 : vector<8x128xi1>, vector<8x128xf32>
    %128 = arith.addf %107, %127 : vector<8x128xf32>
    %c6_i32 = arith.constant 6 : i32
    %129 = arith.index_cast %c6_i32 : i32 to index
    %c0_45 = arith.constant 0 : index
    %c0_46 = arith.constant 0 : index
    %130 = vector.load %arg1[%129, %c0_45, %c0_46] : memref<16x8x1xf32, #tpu.memory_space<vmem>>, vector<1x8x1xf32>
    %131 = vector.shape_cast %130 : vector<1x8x1xf32> to vector<8x1xf32>
    %132 = vector.shape_cast %131 : vector<8x1xf32> to vector<8x1xf32>
    %133 = vector.broadcast %132 : vector<8x1xf32> to vector<8x128xf32>
    %134 = arith.index_cast %c6_i32 : i32 to index
    %c0_47 = arith.constant 0 : index
    %c0_48 = arith.constant 0 : index
    %135 = vector.load %arg2[%134, %c0_47, %c0_48] : memref<16x1x128xf32, #tpu.memory_space<vmem>>, vector<1x1x128xf32>
    %136 = vector.shape_cast %135 : vector<1x1x128xf32> to vector<1x128xf32>
    %137 = vector.broadcast %0 : vector<1x128xf32> to vector<8x128xf32>
    %138 = arith.mulf %133, %137 : vector<8x128xf32>
    %139 = vector.broadcast %136 : vector<1x128xf32> to vector<8x128xf32>
    %140 = arith.addf %139, %138 : vector<8x128xf32>
    %141 = vector.broadcast %1 : vector<1x128xf32> to vector<8x128xf32>
    %142 = arith.addf %140, %141 : vector<8x128xf32>
    %cst_49 = arith.constant 0.000000e+00 : f32
    %143 = vector.broadcast %cst_49 : f32 to vector<8x128xf32>
    %144 = arith.maximumf %142, %143 : vector<8x128xf32>
    %cst_50 = arith.constant 0.000000e+00 : f32
    %145 = vector.broadcast %cst_50 : f32 to vector<8x128xf32>
    %146 = arith.cmpf one, %133, %145 : vector<8x128xf32>
    %cst_51 = arith.constant 0.000000e+00 : f32
    %147 = vector.broadcast %cst_51 : f32 to vector<8x128xf32>
    %148 = arith.select %146, %144, %147 : vector<8x128xi1>, vector<8x128xf32>
    %149 = arith.addf %128, %148 : vector<8x128xf32>
    %c7_i32 = arith.constant 7 : i32
    %150 = arith.index_cast %c7_i32 : i32 to index
    %c0_52 = arith.constant 0 : index
    %c0_53 = arith.constant 0 : index
    %151 = vector.load %arg1[%150, %c0_52, %c0_53] : memref<16x8x1xf32, #tpu.memory_space<vmem>>, vector<1x8x1xf32>
    %152 = vector.shape_cast %151 : vector<1x8x1xf32> to vector<8x1xf32>
    %153 = vector.shape_cast %152 : vector<8x1xf32> to vector<8x1xf32>
    %154 = vector.broadcast %153 : vector<8x1xf32> to vector<8x128xf32>
    %155 = arith.index_cast %c7_i32 : i32 to index
    %c0_54 = arith.constant 0 : index
    %c0_55 = arith.constant 0 : index
    %156 = vector.load %arg2[%155, %c0_54, %c0_55] : memref<16x1x128xf32, #tpu.memory_space<vmem>>, vector<1x1x128xf32>
    %157 = vector.shape_cast %156 : vector<1x1x128xf32> to vector<1x128xf32>
    %158 = vector.broadcast %0 : vector<1x128xf32> to vector<8x128xf32>
    %159 = arith.mulf %154, %158 : vector<8x128xf32>
    %160 = vector.broadcast %157 : vector<1x128xf32> to vector<8x128xf32>
    %161 = arith.addf %160, %159 : vector<8x128xf32>
    %162 = vector.broadcast %1 : vector<1x128xf32> to vector<8x128xf32>
    %163 = arith.addf %161, %162 : vector<8x128xf32>
    %cst_56 = arith.constant 0.000000e+00 : f32
    %164 = vector.broadcast %cst_56 : f32 to vector<8x128xf32>
    %165 = arith.maximumf %163, %164 : vector<8x128xf32>
    %cst_57 = arith.constant 0.000000e+00 : f32
    %166 = vector.broadcast %cst_57 : f32 to vector<8x128xf32>
    %167 = arith.cmpf one, %154, %166 : vector<8x128xf32>
    %cst_58 = arith.constant 0.000000e+00 : f32
    %168 = vector.broadcast %cst_58 : f32 to vector<8x128xf32>
    %169 = arith.select %167, %165, %168 : vector<8x128xi1>, vector<8x128xf32>
    %170 = arith.addf %149, %169 : vector<8x128xf32>
    %c8_i32 = arith.constant 8 : i32
    %171 = arith.index_cast %c8_i32 : i32 to index
    %c0_59 = arith.constant 0 : index
    %c0_60 = arith.constant 0 : index
    %172 = vector.load %arg1[%171, %c0_59, %c0_60] : memref<16x8x1xf32, #tpu.memory_space<vmem>>, vector<1x8x1xf32>
    %173 = vector.shape_cast %172 : vector<1x8x1xf32> to vector<8x1xf32>
    %174 = vector.shape_cast %173 : vector<8x1xf32> to vector<8x1xf32>
    %175 = vector.broadcast %174 : vector<8x1xf32> to vector<8x128xf32>
    %176 = arith.index_cast %c8_i32 : i32 to index
    %c0_61 = arith.constant 0 : index
    %c0_62 = arith.constant 0 : index
    %177 = vector.load %arg2[%176, %c0_61, %c0_62] : memref<16x1x128xf32, #tpu.memory_space<vmem>>, vector<1x1x128xf32>
    %178 = vector.shape_cast %177 : vector<1x1x128xf32> to vector<1x128xf32>
    %179 = vector.broadcast %0 : vector<1x128xf32> to vector<8x128xf32>
    %180 = arith.mulf %175, %179 : vector<8x128xf32>
    %181 = vector.broadcast %178 : vector<1x128xf32> to vector<8x128xf32>
    %182 = arith.addf %181, %180 : vector<8x128xf32>
    %183 = vector.broadcast %1 : vector<1x128xf32> to vector<8x128xf32>
    %184 = arith.addf %182, %183 : vector<8x128xf32>
    %cst_63 = arith.constant 0.000000e+00 : f32
    %185 = vector.broadcast %cst_63 : f32 to vector<8x128xf32>
    %186 = arith.maximumf %184, %185 : vector<8x128xf32>
    %cst_64 = arith.constant 0.000000e+00 : f32
    %187 = vector.broadcast %cst_64 : f32 to vector<8x128xf32>
    %188 = arith.cmpf one, %175, %187 : vector<8x128xf32>
    %cst_65 = arith.constant 0.000000e+00 : f32
    %189 = vector.broadcast %cst_65 : f32 to vector<8x128xf32>
    %190 = arith.select %188, %186, %189 : vector<8x128xi1>, vector<8x128xf32>
    %191 = arith.addf %170, %190 : vector<8x128xf32>
    %c9_i32 = arith.constant 9 : i32
    %192 = arith.index_cast %c9_i32 : i32 to index
    %c0_66 = arith.constant 0 : index
    %c0_67 = arith.constant 0 : index
    %193 = vector.load %arg1[%192, %c0_66, %c0_67] : memref<16x8x1xf32, #tpu.memory_space<vmem>>, vector<1x8x1xf32>
    %194 = vector.shape_cast %193 : vector<1x8x1xf32> to vector<8x1xf32>
    %195 = vector.shape_cast %194 : vector<8x1xf32> to vector<8x1xf32>
    %196 = vector.broadcast %195 : vector<8x1xf32> to vector<8x128xf32>
    %197 = arith.index_cast %c9_i32 : i32 to index
    %c0_68 = arith.constant 0 : index
    %c0_69 = arith.constant 0 : index
    %198 = vector.load %arg2[%197, %c0_68, %c0_69] : memref<16x1x128xf32, #tpu.memory_space<vmem>>, vector<1x1x128xf32>
    %199 = vector.shape_cast %198 : vector<1x1x128xf32> to vector<1x128xf32>
    %200 = vector.broadcast %0 : vector<1x128xf32> to vector<8x128xf32>
    %201 = arith.mulf %196, %200 : vector<8x128xf32>
    %202 = vector.broadcast %199 : vector<1x128xf32> to vector<8x128xf32>
    %203 = arith.addf %202, %201 : vector<8x128xf32>
    %204 = vector.broadcast %1 : vector<1x128xf32> to vector<8x128xf32>
    %205 = arith.addf %203, %204 : vector<8x128xf32>
    %cst_70 = arith.constant 0.000000e+00 : f32
    %206 = vector.broadcast %cst_70 : f32 to vector<8x128xf32>
    %207 = arith.maximumf %205, %206 : vector<8x128xf32>
    %cst_71 = arith.constant 0.000000e+00 : f32
    %208 = vector.broadcast %cst_71 : f32 to vector<8x128xf32>
    %209 = arith.cmpf one, %196, %208 : vector<8x128xf32>
    %cst_72 = arith.constant 0.000000e+00 : f32
    %210 = vector.broadcast %cst_72 : f32 to vector<8x128xf32>
    %211 = arith.select %209, %207, %210 : vector<8x128xi1>, vector<8x128xf32>
    %212 = arith.addf %191, %211 : vector<8x128xf32>
    %c10_i32 = arith.constant 10 : i32
    %213 = arith.index_cast %c10_i32 : i32 to index
    %c0_73 = arith.constant 0 : index
    %c0_74 = arith.constant 0 : index
    %214 = vector.load %arg1[%213, %c0_73, %c0_74] : memref<16x8x1xf32, #tpu.memory_space<vmem>>, vector<1x8x1xf32>
    %215 = vector.shape_cast %214 : vector<1x8x1xf32> to vector<8x1xf32>
    %216 = vector.shape_cast %215 : vector<8x1xf32> to vector<8x1xf32>
    %217 = vector.broadcast %216 : vector<8x1xf32> to vector<8x128xf32>
    %218 = arith.index_cast %c10_i32 : i32 to index
    %c0_75 = arith.constant 0 : index
    %c0_76 = arith.constant 0 : index
    %219 = vector.load %arg2[%218, %c0_75, %c0_76] : memref<16x1x128xf32, #tpu.memory_space<vmem>>, vector<1x1x128xf32>
    %220 = vector.shape_cast %219 : vector<1x1x128xf32> to vector<1x128xf32>
    %221 = vector.broadcast %0 : vector<1x128xf32> to vector<8x128xf32>
    %222 = arith.mulf %217, %221 : vector<8x128xf32>
    %223 = vector.broadcast %220 : vector<1x128xf32> to vector<8x128xf32>
    %224 = arith.addf %223, %222 : vector<8x128xf32>
    %225 = vector.broadcast %1 : vector<1x128xf32> to vector<8x128xf32>
    %226 = arith.addf %224, %225 : vector<8x128xf32>
    %cst_77 = arith.constant 0.000000e+00 : f32
    %227 = vector.broadcast %cst_77 : f32 to vector<8x128xf32>
    %228 = arith.maximumf %226, %227 : vector<8x128xf32>
    %cst_78 = arith.constant 0.000000e+00 : f32
    %229 = vector.broadcast %cst_78 : f32 to vector<8x128xf32>
    %230 = arith.cmpf one, %217, %229 : vector<8x128xf32>
    %cst_79 = arith.constant 0.000000e+00 : f32
    %231 = vector.broadcast %cst_79 : f32 to vector<8x128xf32>
    %232 = arith.select %230, %228, %231 : vector<8x128xi1>, vector<8x128xf32>
    %233 = arith.addf %212, %232 : vector<8x128xf32>
    %c11_i32 = arith.constant 11 : i32
    %234 = arith.index_cast %c11_i32 : i32 to index
    %c0_80 = arith.constant 0 : index
    %c0_81 = arith.constant 0 : index
    %235 = vector.load %arg1[%234, %c0_80, %c0_81] : memref<16x8x1xf32, #tpu.memory_space<vmem>>, vector<1x8x1xf32>
    %236 = vector.shape_cast %235 : vector<1x8x1xf32> to vector<8x1xf32>
    %237 = vector.shape_cast %236 : vector<8x1xf32> to vector<8x1xf32>
    %238 = vector.broadcast %237 : vector<8x1xf32> to vector<8x128xf32>
    %239 = arith.index_cast %c11_i32 : i32 to index
    %c0_82 = arith.constant 0 : index
    %c0_83 = arith.constant 0 : index
    %240 = vector.load %arg2[%239, %c0_82, %c0_83] : memref<16x1x128xf32, #tpu.memory_space<vmem>>, vector<1x1x128xf32>
    %241 = vector.shape_cast %240 : vector<1x1x128xf32> to vector<1x128xf32>
    %242 = vector.broadcast %0 : vector<1x128xf32> to vector<8x128xf32>
    %243 = arith.mulf %238, %242 : vector<8x128xf32>
    %244 = vector.broadcast %241 : vector<1x128xf32> to vector<8x128xf32>
    %245 = arith.addf %244, %243 : vector<8x128xf32>
    %246 = vector.broadcast %1 : vector<1x128xf32> to vector<8x128xf32>
    %247 = arith.addf %245, %246 : vector<8x128xf32>
    %cst_84 = arith.constant 0.000000e+00 : f32
    %248 = vector.broadcast %cst_84 : f32 to vector<8x128xf32>
    %249 = arith.maximumf %247, %248 : vector<8x128xf32>
    %cst_85 = arith.constant 0.000000e+00 : f32
    %250 = vector.broadcast %cst_85 : f32 to vector<8x128xf32>
    %251 = arith.cmpf one, %238, %250 : vector<8x128xf32>
    %cst_86 = arith.constant 0.000000e+00 : f32
    %252 = vector.broadcast %cst_86 : f32 to vector<8x128xf32>
    %253 = arith.select %251, %249, %252 : vector<8x128xi1>, vector<8x128xf32>
    %254 = arith.addf %233, %253 : vector<8x128xf32>
    %c12_i32 = arith.constant 12 : i32
    %255 = arith.index_cast %c12_i32 : i32 to index
    %c0_87 = arith.constant 0 : index
    %c0_88 = arith.constant 0 : index
    %256 = vector.load %arg1[%255, %c0_87, %c0_88] : memref<16x8x1xf32, #tpu.memory_space<vmem>>, vector<1x8x1xf32>
    %257 = vector.shape_cast %256 : vector<1x8x1xf32> to vector<8x1xf32>
    %258 = vector.shape_cast %257 : vector<8x1xf32> to vector<8x1xf32>
    %259 = vector.broadcast %258 : vector<8x1xf32> to vector<8x128xf32>
    %260 = arith.index_cast %c12_i32 : i32 to index
    %c0_89 = arith.constant 0 : index
    %c0_90 = arith.constant 0 : index
    %261 = vector.load %arg2[%260, %c0_89, %c0_90] : memref<16x1x128xf32, #tpu.memory_space<vmem>>, vector<1x1x128xf32>
    %262 = vector.shape_cast %261 : vector<1x1x128xf32> to vector<1x128xf32>
    %263 = vector.broadcast %0 : vector<1x128xf32> to vector<8x128xf32>
    %264 = arith.mulf %259, %263 : vector<8x128xf32>
    %265 = vector.broadcast %262 : vector<1x128xf32> to vector<8x128xf32>
    %266 = arith.addf %265, %264 : vector<8x128xf32>
    %267 = vector.broadcast %1 : vector<1x128xf32> to vector<8x128xf32>
    %268 = arith.addf %266, %267 : vector<8x128xf32>
    %cst_91 = arith.constant 0.000000e+00 : f32
    %269 = vector.broadcast %cst_91 : f32 to vector<8x128xf32>
    %270 = arith.maximumf %268, %269 : vector<8x128xf32>
    %cst_92 = arith.constant 0.000000e+00 : f32
    %271 = vector.broadcast %cst_92 : f32 to vector<8x128xf32>
    %272 = arith.cmpf one, %259, %271 : vector<8x128xf32>
    %cst_93 = arith.constant 0.000000e+00 : f32
    %273 = vector.broadcast %cst_93 : f32 to vector<8x128xf32>
    %274 = arith.select %272, %270, %273 : vector<8x128xi1>, vector<8x128xf32>
    %275 = arith.addf %254, %274 : vector<8x128xf32>
    %c13_i32 = arith.constant 13 : i32
    %276 = arith.index_cast %c13_i32 : i32 to index
    %c0_94 = arith.constant 0 : index
    %c0_95 = arith.constant 0 : index
    %277 = vector.load %arg1[%276, %c0_94, %c0_95] : memref<16x8x1xf32, #tpu.memory_space<vmem>>, vector<1x8x1xf32>
    %278 = vector.shape_cast %277 : vector<1x8x1xf32> to vector<8x1xf32>
    %279 = vector.shape_cast %278 : vector<8x1xf32> to vector<8x1xf32>
    %280 = vector.broadcast %279 : vector<8x1xf32> to vector<8x128xf32>
    %281 = arith.index_cast %c13_i32 : i32 to index
    %c0_96 = arith.constant 0 : index
    %c0_97 = arith.constant 0 : index
    %282 = vector.load %arg2[%281, %c0_96, %c0_97] : memref<16x1x128xf32, #tpu.memory_space<vmem>>, vector<1x1x128xf32>
    %283 = vector.shape_cast %282 : vector<1x1x128xf32> to vector<1x128xf32>
    %284 = vector.broadcast %0 : vector<1x128xf32> to vector<8x128xf32>
    %285 = arith.mulf %280, %284 : vector<8x128xf32>
    %286 = vector.broadcast %283 : vector<1x128xf32> to vector<8x128xf32>
    %287 = arith.addf %286, %285 : vector<8x128xf32>
    %288 = vector.broadcast %1 : vector<1x128xf32> to vector<8x128xf32>
    %289 = arith.addf %287, %288 : vector<8x128xf32>
    %cst_98 = arith.constant 0.000000e+00 : f32
    %290 = vector.broadcast %cst_98 : f32 to vector<8x128xf32>
    %291 = arith.maximumf %289, %290 : vector<8x128xf32>
    %cst_99 = arith.constant 0.000000e+00 : f32
    %292 = vector.broadcast %cst_99 : f32 to vector<8x128xf32>
    %293 = arith.cmpf one, %280, %292 : vector<8x128xf32>
    %cst_100 = arith.constant 0.000000e+00 : f32
    %294 = vector.broadcast %cst_100 : f32 to vector<8x128xf32>
    %295 = arith.select %293, %291, %294 : vector<8x128xi1>, vector<8x128xf32>
    %296 = arith.addf %275, %295 : vector<8x128xf32>
    %c14_i32 = arith.constant 14 : i32
    %297 = arith.index_cast %c14_i32 : i32 to index
    %c0_101 = arith.constant 0 : index
    %c0_102 = arith.constant 0 : index
    %298 = vector.load %arg1[%297, %c0_101, %c0_102] : memref<16x8x1xf32, #tpu.memory_space<vmem>>, vector<1x8x1xf32>
    %299 = vector.shape_cast %298 : vector<1x8x1xf32> to vector<8x1xf32>
    %300 = vector.shape_cast %299 : vector<8x1xf32> to vector<8x1xf32>
    %301 = vector.broadcast %300 : vector<8x1xf32> to vector<8x128xf32>
    %302 = arith.index_cast %c14_i32 : i32 to index
    %c0_103 = arith.constant 0 : index
    %c0_104 = arith.constant 0 : index
    %303 = vector.load %arg2[%302, %c0_103, %c0_104] : memref<16x1x128xf32, #tpu.memory_space<vmem>>, vector<1x1x128xf32>
    %304 = vector.shape_cast %303 : vector<1x1x128xf32> to vector<1x128xf32>
    %305 = vector.broadcast %0 : vector<1x128xf32> to vector<8x128xf32>
    %306 = arith.mulf %301, %305 : vector<8x128xf32>
    %307 = vector.broadcast %304 : vector<1x128xf32> to vector<8x128xf32>
    %308 = arith.addf %307, %306 : vector<8x128xf32>
    %309 = vector.broadcast %1 : vector<1x128xf32> to vector<8x128xf32>
    %310 = arith.addf %308, %309 : vector<8x128xf32>
    %cst_105 = arith.constant 0.000000e+00 : f32
    %311 = vector.broadcast %cst_105 : f32 to vector<8x128xf32>
    %312 = arith.maximumf %310, %311 : vector<8x128xf32>
    %cst_106 = arith.constant 0.000000e+00 : f32
    %313 = vector.broadcast %cst_106 : f32 to vector<8x128xf32>
    %314 = arith.cmpf one, %301, %313 : vector<8x128xf32>
    %cst_107 = arith.constant 0.000000e+00 : f32
    %315 = vector.broadcast %cst_107 : f32 to vector<8x128xf32>
    %316 = arith.select %314, %312, %315 : vector<8x128xi1>, vector<8x128xf32>
    %317 = arith.addf %296, %316 : vector<8x128xf32>
    %c15_i32 = arith.constant 15 : i32
    %318 = arith.index_cast %c15_i32 : i32 to index
    %c0_108 = arith.constant 0 : index
    %c0_109 = arith.constant 0 : index
    %319 = vector.load %arg1[%318, %c0_108, %c0_109] : memref<16x8x1xf32, #tpu.memory_space<vmem>>, vector<1x8x1xf32>
    %320 = vector.shape_cast %319 : vector<1x8x1xf32> to vector<8x1xf32>
    %321 = vector.shape_cast %320 : vector<8x1xf32> to vector<8x1xf32>
    %322 = vector.broadcast %321 : vector<8x1xf32> to vector<8x128xf32>
    %323 = arith.index_cast %c15_i32 : i32 to index
    %c0_110 = arith.constant 0 : index
    %c0_111 = arith.constant 0 : index
    %324 = vector.load %arg2[%323, %c0_110, %c0_111] : memref<16x1x128xf32, #tpu.memory_space<vmem>>, vector<1x1x128xf32>
    %325 = vector.shape_cast %324 : vector<1x1x128xf32> to vector<1x128xf32>
    %326 = vector.broadcast %0 : vector<1x128xf32> to vector<8x128xf32>
    %327 = arith.mulf %322, %326 : vector<8x128xf32>
    %328 = vector.broadcast %325 : vector<1x128xf32> to vector<8x128xf32>
    %329 = arith.addf %328, %327 : vector<8x128xf32>
    %330 = vector.broadcast %1 : vector<1x128xf32> to vector<8x128xf32>
    %331 = arith.addf %329, %330 : vector<8x128xf32>
    %cst_112 = arith.constant 0.000000e+00 : f32
    %332 = vector.broadcast %cst_112 : f32 to vector<8x128xf32>
    %333 = arith.maximumf %331, %332 : vector<8x128xf32>
    %cst_113 = arith.constant 0.000000e+00 : f32
    %334 = vector.broadcast %cst_113 : f32 to vector<8x128xf32>
    %335 = arith.cmpf one, %322, %334 : vector<8x128xf32>
    %cst_114 = arith.constant 0.000000e+00 : f32
    %336 = vector.broadcast %cst_114 : f32 to vector<8x128xf32>
    %337 = arith.select %335, %333, %336 : vector<8x128xi1>, vector<8x128xf32>
    %338 = arith.addf %317, %337 : vector<8x128xf32>
    %c16_i32 = arith.constant 16 : i32
    %c0_115 = arith.constant 0 : index
    %c0_116 = arith.constant 0 : index
    %339 = vector.load %arg3[%c0_115, %c0_116] : memref<8x128xf32, #tpu.memory_space<vmem>>, vector<8x128xf32>
    %cst_117 = arith.constant 1.000000e+00 : f32
    %340 = vector.broadcast %cst_117 : f32 to vector<8x128xf32>
    %341 = arith.mulf %340, %339 : vector<8x128xf32>
    %342 = arith.addf %338, %341 : vector<8x128xf32>
    %343 = arith.truncf %342 : vector<8x128xf32> to vector<8x128xbf16>
    %c0_118 = arith.constant 0 : index
    %c0_119 = arith.constant 0 : index
    %344 = vector.load %arg6[%c0_118, %c0_119] : memref<128x128xbf16, #tpu.memory_space<vmem>>, vector<128x128xbf16>
    %cst_120 = arith.constant dense<0.000000e+00> : vector<8x128xf32>
    %345 = tpu.matmul %343, %344, %cst_120 {dimension_numbers = #tpu.dot_dimension_numbers<[1], [0], [0], [1], [0, 0, 1, 1], [], []>} : vector<8x128xbf16>, vector<128x128xbf16>, vector<8x128xf32> -> vector<8x128xf32>
    %c0_121 = arith.constant 0 : index
    %c0_122 = arith.constant 0 : index
    %346 = vector.load %arg7[%c0_121, %c0_122] : memref<1x128xf32, #tpu.memory_space<vmem>>, vector<1x128xf32>
    %347 = vector.broadcast %346 : vector<1x128xf32> to vector<8x128xf32>
    %348 = arith.addf %345, %347 : vector<8x128xf32>
    %cst_123 = arith.constant 0.000000e+00 : f32
    %349 = vector.broadcast %cst_123 : f32 to vector<8x128xf32>
    %350 = arith.maximumf %348, %349 : vector<8x128xf32>
    %351 = arith.truncf %350 : vector<8x128xf32> to vector<8x128xbf16>
    %c0_124 = arith.constant 0 : index
    %c0_125 = arith.constant 0 : index
    %352 = vector.load %arg8[%c0_124, %c0_125] : memref<128x128xbf16, #tpu.memory_space<vmem>>, vector<128x128xbf16>
    %cst_126 = arith.constant dense<0.000000e+00> : vector<8x128xf32>
    %353 = tpu.matmul %351, %352, %cst_126 {dimension_numbers = #tpu.dot_dimension_numbers<[1], [0], [0], [1], [0, 0, 1, 1], [], []>} : vector<8x128xbf16>, vector<128x128xbf16>, vector<8x128xf32> -> vector<8x128xf32>
    %c0_127 = arith.constant 0 : index
    %c0_128 = arith.constant 0 : index
    %354 = vector.load %arg9[%c0_127, %c0_128] : memref<1x128xf32, #tpu.memory_space<vmem>>, vector<1x128xf32>
    %355 = vector.broadcast %354 : vector<1x128xf32> to vector<8x128xf32>
    %356 = arith.addf %353, %355 : vector<8x128xf32>
    %cst_129 = arith.constant 0.000000e+00 : f32
    %357 = vector.broadcast %cst_129 : f32 to vector<8x128xf32>
    %358 = arith.maximumf %356, %357 : vector<8x128xf32>
    %c0_130 = arith.constant 0 : index
    %c0_131 = arith.constant 0 : index
    %359 = vector.load %arg10[%c0_130, %c0_131] : memref<8x128xf32, #tpu.memory_space<vmem>>, vector<8x128xf32>
    tpu.vector_store %arg10[%c0_130, %c0_131], %358 {strides = array<i32>} : memref<8x128xf32, #tpu.memory_space<vmem>>, vector<8x128xf32>,
    return
  }
  func.func @transform_0(%arg0: i32) -> (i32, i32, i32) {
    %c0_i32 = arith.constant 0 : i32
    %c0_i32_0 = arith.constant 0 : i32
    %c0_i32_1 = arith.constant 0 : i32
    return %c0_i32, %arg0, %c0_i32_0 : i32, i32, i32
  }
  func.func @transform_1(%arg0: i32) -> (i32, i32, i32) {
    %c0_i32 = arith.constant 0 : i32
    %c0_i32_0 = arith.constant 0 : i32
    %c0_i32_1 = arith.constant 0 : i32
    %c0_i32_2 = arith.constant 0 : i32
    return %c0_i32, %c0_i32_0, %c0_i32_1 : i32, i32, i32
  }
  func.func @transform_2(%arg0: i32) -> (i32, i32) {
    %c0_i32 = arith.constant 0 : i32
    %c0_i32_0 = arith.constant 0 : i32
    return %arg0, %c0_i32 : i32, i32
  }
  func.func @transform_3(%arg0: i32) -> (i32, i32) {
    %c0_i32 = arith.constant 0 : i32
    %c0_i32_0 = arith.constant 0 : i32
    %c0_i32_1 = arith.constant 0 : i32
    return %c0_i32, %c0_i32_0 : i32, i32
  }
  func.func @transform_4(%arg0: i32) -> (i32, i32) {
    %c0_i32 = arith.constant 0 : i32
    %c0_i32_0 = arith.constant 0 : i32
    %c0_i32_1 = arith.constant 0 : i32
    return %c0_i32, %c0_i32_0 : i32, i32
  }
  func.func @transform_5(%arg0: i32) -> (i32, i32) {
    %c0_i32 = arith.constant 0 : i32
    %c0_i32_0 = arith.constant 0 : i32
    %c0_i32_1 = arith.constant 0 : i32
    return %c0_i32, %c0_i32_0 : i32, i32
  }
  func.func @transform_6(%arg0: i32) -> (i32, i32) {
    %c0_i32 = arith.constant 0 : i32
    %c0_i32_0 = arith.constant 0 : i32
    %c0_i32_1 = arith.constant 0 : i32
    return %c0_i32, %c0_i32_0 : i32, i32
  }
  func.func @transform_7(%arg0: i32) -> (i32, i32) {
    %c0_i32 = arith.constant 0 : i32
    %c0_i32_0 = arith.constant 0 : i32
    %c0_i32_1 = arith.constant 0 : i32
    return %c0_i32, %c0_i32_0 : i32, i32
  }
  func.func @transform_8(%arg0: i32) -> (i32, i32) {
    %c0_i32 = arith.constant 0 : i32
    %c0_i32_0 = arith.constant 0 : i32
    %c0_i32_1 = arith.constant 0 : i32
    return %c0_i32, %c0_i32_0 : i32, i32
  }
  func.func @transform_9(%arg0: i32) -> (i32, i32) {
    %c0_i32 = arith.constant 0 : i32
    %c0_i32_0 = arith.constant 0 : i32
    return %arg0, %c0_i32 : i32, i32
  }
}

</mosaic_0001>

<bundles_post_ra>
// kernel: tpu_custom_call.1
= control target key start
LH: loop header
LB: loop body
LE: loop exit
PB: predicated region body
PF: predicated region fallthrough
CT: control target
= control target key end

     0   :  { %14 = vsyncpa [#allocation4], 0  ;;  %s1757_s0 = inlined_call_operand.vmem [shape: f32[16,16,1], index: 0, kind: input, shape index: {}]   ;;  %s1758_s1 = inlined_call_operand.vmem [shape: f32[16,1,128], index: 1, kind: input, shape index: {}]   ;;  %s1759_s2 = inlined_call_operand.vmem [shape: f32[16,128], index: 2, kind: input, shape index: {}]   ;;  %s1760_s3 = inlined_call_operand.vmem [shape: f32[1,128], index: 3, kind: input, shape index: {}]   ;;  %s1761_s4 = inlined_call_operand.vmem [shape: f32[1,128], index: 4, kind: input, shape index: {}]   ;;  %s1762_s5 = inlined_call_operand.vmem [shape: bf16[128,128], index: 5, kind: input, shape index: {}]   ;;  %s1763_s6 = inlined_call_operand.vmem [shape: f32[1,128], index: 6, kind: input, shape index: {}]   ;;  %s1764_s7 = inlined_call_operand.vmem [shape: bf16[128,128], index: 7, kind: input, shape index: {}]   ;;  %s1765_s8 = inlined_call_operand.vmem [shape: f32[1,128], index: 8, kind: input, shape index: {}]   ;;  %s1766_s9 = inlined_call_operand.hbm [shape: f32[16,128], index: 9, kind: output, shape index: {}]  }
   0x1   :  { %16 = vsyncpa [#allocation4 + $0x1], 0  ;;  %s1442_s30 = smov 0   ;;  %s1444_s10 = smov 0  }
   0x2   :  { %s1446_s11 = smov 0   ;;  %s1448_s12 = smov 0  }
   0x3 LB: > { %s1463_s13 = sadd.s32 4294967295, %s1386_s12   ;;  %s1127_s14 = sadd.s32 4294967294, %s1386_s12   ;;  %s1386_s12 = sphi %s1448_s12, %s1772_s12   ;;  %s1382_s11 = sphi %s1446_s11, %s1771_s11   ;;  %s1378_s10 = sphi %s1444_s10, %s1770_s10   ;;  %s1374_s30 = sphi %s1442_s30, %s1769_s30  }
   0x4   : > { %s1467_s15 = sadd.s32 1, %s1386_s12   ;;  %s29_s16 = sadd.s32 1, %s1382_s11 }
   0x5   : > { %s26_s17 = ssub.s32 %s1386_s12, %s1467_s15  ;;  %p36_p0 = scmp.ne.s32.totalorder %s1382_s11, %s1378_s10 }
   0x6   : > { %p27_p1 = scmp.eq.s32.totalorder %s26_s17, 0  ;;  %p37_p2 = scmp.eq.s32.totalorder %s1386_s12, 0 }
   0x7   : > { %p239_p3 = scmp.eq.s32.totalorder %s1463_s13, 1  ;;  %p244_p4 = scmp.ne.s32.totalorder %s1378_s10, %s1374_s30 }
   0x8   : > { %s1479_s18 = scalar_select %p27_p1, %s1382_s11, %s29_s16  }
   0x9   : > { %p38_p5 = por %p37_p2, %p36_p0  ;;  %p1481_p6 = por %p239_p3, %p36_p0 }
   0xa   : > { %p245_p7 = scmp.eq.s32.totalorder %s1127_s14, 1  ;;  %p1129_p9 = scmp.ge.s32.totalorder %s1386_s12, 2 }
   0xc   : > { %p1485_p8 = por %p245_p7, %p244_p4  ;;  %282 = sbr.rel (%p1129_p9) target bundleno = 31 (0x1f), region = 44 }
  0x13   : > { %285 = sbr.rel (!%p38_p5) target bundleno = 31 (0x1f), region = 48  ;;  %s287_s21 = sand.u32 (%p38_p5), 1, %s1382_s11  }
  0x14   : > { %s1131_s22 = sshll.u32 (%p38_p5), %s1386_s12, 3  ;;  %s1130_s23 = sshll.u32 (%p38_p5), %s287_s21, 7 }
  0x15   : > { %s1497_s26 = scalar_lea.vmem (%p38_p5), %s1757_s0, %s1131_s22  ;;  %s289_s27 = scalar_lea.vmem (%p38_p5), [#allocation2], %s1130_s23 }
  0x16   : > { %v349_v0 = vld [vmem:[%s1497_s26] sm:$0xff] (%p38_p5)  ;;  %v351_v1 = vld [vmem:[%s1497_s26 + $0x10] sm:$0xff] (%p38_p5) }
  0x17   : > { %v353_v2 = vld [vmem:[%s1497_s26 + $0x20] sm:$0xff] (%p38_p5)  ;;  %350 = vst [vmem:[%s289_s27] sm:$0xff] (%p38_p5), %v349_v0  ;;  %352 = vst [vmem:[%s289_s27 + $0x8] sm:$0xff] (%p38_p5), %v351_v1  ;;  %v355_v3 = vld [vmem:[%s1497_s26 + $0x30] sm:$0xff] (%p38_p5) }
  0x18   : > { %354 = vst [vmem:[%s289_s27 + $0x10] sm:$0xff] (%p38_p5), %v353_v2  ;;  %v357_v4 = vld [vmem:[%s1497_s26 + $0x40] sm:$0xff] (%p38_p5)  ;;  %v359_v5 = vld [vmem:[%s1497_s26 + $0x50] sm:$0xff] (%p38_p5)  ;;  %356 = vst [vmem:[%s289_s27 + $0x18] sm:$0xff] (%p38_p5), %v355_v3 }
  0x19   : > { %358 = vst [vmem:[%s289_s27 + $0x20] sm:$0xff] (%p38_p5), %v357_v4  ;;  %360 = vst [vmem:[%s289_s27 + $0x28] sm:$0xff] (%p38_p5), %v359_v5  ;;  %v361_v6 = vld [vmem:[%s1497_s26 + $0x60] sm:$0xff] (%p38_p5)  ;;  %v363_v7 = vld [vmem:[%s1497_s26 + $0x70] sm:$0xff] (%p38_p5) }
  0x1a   : > { %v365_v8 = vld [vmem:[%s1497_s26 + $0x80] sm:$0xff]  ;;  %362 = vst [vmem:[%s289_s27 + $0x30] sm:$0xff] %v361_v6  ;;  %364 = vst [vmem:[%s289_s27 + $0x38] sm:$0xff] %v363_v7  ;;  %v367_v9 = vld [vmem:[%s1497_s26 + $0x90] sm:$0xff] }
  0x1b   : > { %366 = vst [vmem:[%s289_s27 + $0x40] sm:$0xff] %v365_v8  ;;  %v369_v10 = vld [vmem:[%s1497_s26 + $0xa0] sm:$0xff]  ;;  %v371_v11 = vld [vmem:[%s1497_s26 + $0xb0] sm:$0xff]  ;;  %368 = vst [vmem:[%s289_s27 + $0x48] sm:$0xff] %v367_v9 }
  0x1c   : > { %370 = vst [vmem:[%s289_s27 + $0x50] sm:$0xff] %v369_v10  ;;  %372 = vst [vmem:[%s289_s27 + $0x58] sm:$0xff] %v371_v11  ;;  %v373_v12 = vld [vmem:[%s1497_s26 + $0xc0] sm:$0xff]  ;;  %v375_v13 = vld [vmem:[%s1497_s26 + $0xd0] sm:$0xff] }
  0x1d   : > { %v377_v14 = vld [vmem:[%s1497_s26 + $0xe0] sm:$0xff]  ;;  %374 = vst [vmem:[%s289_s27 + $0x60] sm:$0xff] %v373_v12  ;;  %376 = vst [vmem:[%s289_s27 + $0x68] sm:$0xff] %v375_v13  ;;  %v379_v15 = vld [vmem:[%s1497_s26 + $0xf0] sm:$0xff] }
  0x1e   : > { %378 = vst [vmem:[%s289_s27 + $0x70] sm:$0xff] %v377_v14  ;;  %380 = vst [vmem:[%s289_s27 + $0x78] sm:$0xff] %v379_v15 }
  0x1f PF: > { %p1132_p10 = scmp.ge.s32.totalorder %s1386_s12, 1  ;;  %p392_p11 = scmp.lt.s32.totalorder %s1386_s12, 3 }
  0x21   : > { %p393_p12 = pnand %p1132_p10, %p392_p11 }
  0x22   : > { %s1518_s28 = sand.u32 (!%p393_p12), 1, %s1378_s10   ;;  %v1388_v16 = vmov (!%p393_p12), 0   ;;  %v1308_v27 = vld [vmem:[%s1762_s5] sm:$0xff] (!%p393_p12)   ;;  %v1389_v30 = vmov (!%p393_p12), 0.0   ;;  %v1309_v31 = vld [vmem:[%s1762_s5 + $0x8] sm:$0xff] (!%p393_p12)   ;;  %v1310_v34 = vld [vmem:[%s1762_s5 + $0x10] sm:$0xff] (!%p393_p12)  }
  0x23   : > { %396 = sbr.rel (%p393_p12) target bundleno = 661 (0x295), region = 90  ;;  %1307 = vset.pattern.permute.xlu1 (!%p393_p12), %v1388_v16  ;;  %1306 = vset.pattern.permute.xlu0 (!%p393_p12), %v1388_v16  ;;  %s1133_s29 = sshll.u32 (!%p393_p12), %s1518_s28, 7  ;;  %v1311_v37 = vld [vmem:[%s1762_s5 + $0x18] sm:$0xff] (!%p393_p12)   ;;  %v1312_v38 = vld [vmem:[%s1762_s5 + $0x20] sm:$0xff] (!%p393_p12)   ;;  %v1313_v39 = vld [vmem:[%s1762_s5 + $0x28] sm:$0xff] (!%p393_p12)   ;;  %vm1390_vm0 = vmmov (!%p393_p12), 0  }
  0x24   : > { %s1521_s14 = scalar_lea.vmem (!%p393_p12), [#allocation2], %s1133_s29  ;;  %1224 = vmatprep.subr.bf16.mxu0 (!%p393_p12), %v1389_v30  ;;  %1244 = vmatprep.subr.bf16.mxu1 (!%p393_p12), %v1389_v30  ;;  %v1314_v40 = vld [vmem:[%s1762_s5 + $0x30] sm:$0xff] (!%p393_p12)   ;;  %v1315_v41 = vld [vmem:[%s1762_s5 + $0x38] sm:$0xff] (!%p393_p12)   ;;  %v1316_v42 = vld [vmem:[%s1764_s7] sm:$0xff] (!%p393_p12)   ;;  %p438_p13 = scmp.lt.s32.totalorder (!%p393_p12), %s1463_s13, 1 }
  0x25   : > { %v1142_v17 = vld [vmem:[%s1521_s14 + $0x10] sm:$0xff] (!%p393_p12)  ;;  %v445_v18 = vld [vmem:[%s1521_s14] sm:$0xff] (!%p393_p12)  ;;  %v1145_v19 = vld [vmem:[%s1521_s14 + $0x18] sm:$0xff] (!%p393_p12)  ;;  %1225 = vmatpush3.bf16.msra.mxu0 (!%p393_p12), %v1308_v27  ;;  %1240 = vmatprep.mubr.msk.bf16.mxu0 (!%p393_p12), %vm1390_vm0, %v1389_v30  ;;  %s1203_s17 = sshll.u32 (!%p393_p12), %s1463_s13, 7  ;;  %s1037_s26 = scalar_lea.sflag (!%p393_p12), [#allocation4], %s1518_s28 }
  0x26   : > { %503 = vperm.xlu1 (!%p393_p12), %1307, %v1142_v17   ;;  %448 = vperm.xlu0 (!%p393_p12), %1306, %v445_v18   ;;  %v1139_v20 = vld [vmem:[%s1521_s14 + $0x8] sm:$0xff] (!%p393_p12)  ;;  %v1148_v22 = vld [vmem:[%s1521_s14 + $0x20] sm:$0xff] (!%p393_p12)  ;;  %v1157_v23 = vld [vmem:[%s1521_s14 + $0x38] sm:$0xff] (!%p393_p12)  ;;  %s1713_s25 = scalar_lea.hbm (!%p393_p12), %s1766_s9, %s1203_s17  ;;  %s1391_s27 = smov (!%p393_p12), [#allocation3]  }
  0x27   : > { %v1151_v21 = vld [vmem:[%s1521_s14 + $0x28] sm:$0xff] (!%p393_p12)  ;;  %v1154_v24 = vld [vmem:[%s1521_s14 + $0x30] sm:$0xff] (!%p393_p12)  ;;  %v1160_v26 = vld [vmem:[%s1521_s14 + $0x40] sm:$0xff] (!%p393_p12)  ;;  %1226 = vmatprep.subr.bf16.mxu0 (!%p393_p12), %v1389_v30  ;;  %1260 = vmatprep.mubr.msk.bf16.mxu1 (!%p393_p12), %vm1390_vm0, %v1389_v30 }
  0x28   : > { %v1163_v25 = vld [vmem:[%s1521_s14 + $0x48] sm:$0xff] (!%p393_p12)  ;;  %v1169_v28 = vld [vmem:[%s1521_s14 + $0x58] sm:$0xff] (!%p393_p12)  ;;  %v1166_v29 = vld [vmem:[%s1521_s14 + $0x50] sm:$0xff] (!%p393_p12)  ;;  %1245 = vmatpush3.bf16.msra.mxu1 (!%p393_p12), %v1316_v42 }
  0x29   : > { %v1175_v32 = vld [vmem:[%s1521_s14 + $0x68] sm:$0xff] (!%p393_p12)  ;;  %v1172_v33 = vld [vmem:[%s1521_s14 + $0x60] sm:$0xff] (!%p393_p12)  ;;  %1227 = vmatpush3.bf16.msra.mxu0 (!%p393_p12), %v1309_v31  ;;  %v1181_v35 = vld [vmem:[%s1521_s14 + $0x78] sm:$0xff] (!%p393_p12)  ;;  %1246 = vmatprep.subr.bf16.mxu1 (!%p393_p12), %v1389_v30 }
  0x2a   : > { %525 = vperm.xlu1 %1307, %v1145_v19   ;;  %481 = vperm.xlu0 %1306, %v1139_v20   ;;  %v1178_v36 = vld [vmem:[%s1521_s14 + $0x70] sm:$0xff]  ;;  %v1317_v43 = vld [vmem:[%s1764_s7 + $0x8] sm:$0xff]   ;;  %v1319_v45 = vld [vmem:[%s1764_s7 + $0x18] sm:$0xff]   ;;  %s439_s29 = scalar_select %p438_p13, %s1463_s13, 1 }
  0x2b   : > { %1228 = vmatprep.subr.bf16.mxu0 %v1389_v30  ;;  %v1318_v44 = vld [vmem:[%s1764_s7 + $0x10] sm:$0xff]   ;;  %v1320_v46 = vld [vmem:[%s1764_s7 + $0x20] sm:$0xff]   ;;  %v1321_v47 = vld [vmem:[%s1764_s7 + $0x28] sm:$0xff]  }
  0x2c   : > { %1247 = vmatpush3.bf16.msra.mxu1 %v1317_v43  ;;  %v1601_v48 = vld [vmem:[%s1760_s3] ss:$0 sm:$0xff]  ;;  %v1144_v52 = vld [vmem:[%s1758_s1 + $0x2] ss:$0 sm:$0xff]  ;;  %v1147_v58 = vld [vmem:[%s1758_s1 + $0x3] ss:$0 sm:$0xff] }
  0x2d   : > { %1229 = vmatpush3.bf16.msra.mxu0 %v1310_v34  ;;  %1248 = vmatprep.subr.bf16.mxu1 %v1389_v30  ;;  %v1137_v50 = vld [vmem:[%s1758_s1] ss:$0 sm:$0xff]  ;;  %v1141_v63 = vld [vmem:[%s1758_s1 + $0x1] ss:$0 sm:$0xff]  ;;  %v1153_v4 = vld [vmem:[%s1758_s1 + $0x5] ss:$0 sm:$0xff] }
  0x2e   : > { %569 = vperm.xlu1 %1307, %v1151_v21   ;;  %547 = vperm.xlu0 %1306, %v1148_v22   ;;  %v1614_v55 = vld [vmem:[%s1761_s4] ss:$0 sm:$0xff]  ;;  %v1150_v10 = vld [vmem:[%s1758_s1 + $0x4] ss:$0 sm:$0xff]  ;;  %v1159_v17 = vld [vmem:[%s1758_s1 + $0x7] ss:$0 sm:$0xff] }
  0x2f   : > { %1230 = vmatprep.subr.bf16.mxu0 %v1389_v30  ;;  %v1165_v34 = vld [vmem:[%s1758_s1 + $0x9] ss:$0 sm:$0xff]  ;;  %s1135_s14 = sshll.u32 %s439_s29, 3  ;;  %s1134_s29 = sshll.u32 %s1518_s28, 3 }
  0x30   : > { %1249 = vmatpush3.bf16.msra.mxu1 %v1318_v44  ;;  %s441_s21 = scalar_lea.vmem %s1759_s2, %s1135_s14 }
  0x31   : > { %1231 = vmatpush3.bf16.msra.mxu0 %v1311_v37  ;;  %1250 = vmatprep.subr.bf16.mxu1 %v1389_v30 }
  0x32   : > { %613 = vperm.xlu1 %1307, %v1157_v23   ;;  %591 = vperm.xlu0 %1306, %v1154_v24   ;;  %v1156_v23 = vld [vmem:[%s1758_s1 + $0x6] ss:$0 sm:$0xff] }
  0x33   : > { %1232 = vmatprep.subr.bf16.mxu0 %v1389_v30 }
  0x34   : > { %1251 = vmatpush3.bf16.msra.mxu1 %v1319_v45 }
  0x35   : > { %1233 = vmatpush3.bf16.msra.mxu0 %v1312_v38  ;;  %1252 = vmatprep.subr.bf16.mxu1 %v1389_v30 }
  0x36   : > { %657 = vperm.xlu1 %1307, %v1163_v25   ;;  %635 = vperm.xlu0 %1306, %v1160_v26  }
  0x37   : > { %1234 = vmatprep.subr.bf16.mxu0 %v1389_v30 }
  0x38   : > { %1253 = vmatpush3.bf16.msra.mxu1 %v1320_v46 }
  0x39   : > { %1235 = vmatpush3.bf16.msra.mxu0 %v1313_v39  ;;  %1254 = vmatprep.subr.bf16.mxu1 %v1389_v30 }
  0x3a   : > { %701 = vperm.xlu1 %1307, %v1169_v28   ;;  %679 = vperm.xlu0 %1306, %v1166_v29  }
  0x3b   : > { %1236 = vmatprep.subr.bf16.mxu0 %v1389_v30 }
  0x3c   : > { %1255 = vmatpush3.bf16.msra.mxu1 %v1321_v47 }
  0x3d   : > { %1237 = vmatpush3.bf16.msra.mxu0 %v1314_v40  ;;  %1256 = vmatprep.subr.bf16.mxu1 %v1389_v30  ;;  %v1162_v40 = vld [vmem:[%s1758_s1 + $0x8] ss:$0 sm:$0xff] }
  0x3e   : > { %745 = vperm.xlu1 %1307, %v1175_v32   ;;  %723 = vperm.xlu0 %1306, %v1172_v33  }
  0x3f   : > { %1238 = vmatprep.subr.bf16.mxu0 %v1389_v30 }
  0x41   : > { %1239 = vmatpush3.bf16.msra.mxu0 %v1315_v41 }
  0x42   : > { %789 = vperm.xlu1 %1307, %v1181_v35   ;;  %767 = vperm.xlu0 %1306, %v1178_v36  }
  0xa5   : > { %v504_v49 = vpop.permute.xlu1 %503  ;;  %v449_v51 = vpop.permute.xlu0 %448 }
  0xa6   : > { %v508_v53 = vmul.f32 %v1601_v48, %v504_v49  ;;  %v458_v54 = vmul.f32 %v1601_v48, %v449_v51  ;;  %vm474_vm1 = vcmp.ne.f32.partialorder %v449_v51, 0.0  ;;  %vm518_vm3 = vcmp.ne.f32.partialorder %v504_v49, 0.0  ;;  %v1171_v51 = vld [vmem:[%s1758_s1 + $0xb] ss:$0 sm:$0xff] }
  0xa8   : > { %v465_v56 = vadd.f32 %v1137_v50, %v458_v54  ;;  %v515_v57 = vadd.f32 %v1144_v52, %v508_v53 }
  0xa9   : > { %v526_v59 = vpop.permute.xlu1 %525  ;;  %v482_v60 = vpop.permute.xlu0 %481 }
  0xaa   : > { %v472_v61 = vadd.f32 %v1614_v55, %v465_v56  ;;  %v530_v62 = vmul.f32 %v1601_v48, %v526_v59  ;;  %v486_v0 = vmul.f32 %v1601_v48, %v482_v60  ;;  %v516_v2 = vadd.f32 %v1614_v55, %v515_v57 }
  0xab   : > { %vm496_vm2 = vcmp.ne.f32.partialorder %v482_v60, 0.0  ;;  %vm540_vm4 = vcmp.ne.f32.partialorder %v526_v59, 0.0 }
  0xac   : > { %v537_v1 = vadd.f32 %v1147_v58, %v530_v62  ;;  %v493_v3 = vadd.f32 %v1141_v63, %v486_v0  ;;  %v473_v7 = vmax.f32 %v472_v61, 0.0  ;;  %v517_v14 = vmax.f32 %v516_v2, 0.0  ;;  %v1168_v58 = vld [vmem:[%s1758_s1 + $0xa] ss:$0 sm:$0xff] }
  0xad   : > { %v570_v5 = vpop.permute.xlu1 %569  ;;  %v548_v6 = vpop.permute.xlu0 %547 }
  0xae   : > { %v538_v8 = vadd.f32 %v1614_v55, %v537_v1  ;;  %v574_v9 = vmul.f32 %v1601_v48, %v570_v5  ;;  %v494_v11 = vadd.f32 %v1614_v55, %v493_v3  ;;  %v552_v12 = vmul.f32 %v1601_v48, %v548_v6 }
  0xaf   : > { %v475_v20 = vsel %vm474_vm1, %v473_v7, 0.0  ;;  %v519_v31 = vsel %vm518_vm3, %v517_v14, 0.0  ;;  %vm562_vm5 = vcmp.ne.f32.partialorder %v548_v6, 0.0  ;;  %vm584_vm6 = vcmp.ne.f32.partialorder %v570_v5, 0.0 }
  0xb0   : > { %v581_v13 = vadd.f32 %v1153_v4, %v574_v9  ;;  %v495_v15 = vmax.f32 %v494_v11, 0.0  ;;  %v559_v16 = vadd.f32 %v1150_v10, %v552_v12  ;;  %v539_v21 = vmax.f32 %v538_v8, 0.0  ;;  %v1177_v4 = vld [vmem:[%s1758_s1 + $0xd] ss:$0 sm:$0xff]  ;;  %v1174_v10 = vld [vmem:[%s1758_s1 + $0xc] ss:$0 sm:$0xff] }
  0xb1   : > { %v614_v18 = vpop.permute.xlu1 %613  ;;  %v592_v19 = vpop.permute.xlu0 %591 }
  0xb2   : > { %v618_v22 = vmul.f32 %v1601_v48, %v614_v18  ;;  %v497_v24 = vsel %vm496_vm2, %v495_v15, 0.0  ;;  %v582_v25 = vadd.f32 %v1614_v55, %v581_v13  ;;  %v560_v26 = vadd.f32 %v1614_v55, %v559_v16 }
  0xb3   : > { %v596_v27 = vmul.f32 %v1601_v48, %v592_v19  ;;  %v498_v28 = vadd.f32 %v497_v24, %v475_v20  ;;  %v541_v37 = vsel %vm540_vm4, %v539_v21, 0.0  ;;  %vm606_vm7 = vcmp.ne.f32.partialorder %v592_v19, 0.0  ;;  %v1183_v20 = vld [vmem:[%s1758_s1 + $0xf] ss:$0 sm:$0xff] }
  0xb4   : > { %v625_v29 = vadd.f32 %v1159_v17, %v618_v22  ;;  %v561_v32 = vmax.f32 %v560_v26, 0.0  ;;  %v583_v41 = vmax.f32 %v582_v25, 0.0  ;;  %vm628_vm8 = vcmp.ne.f32.partialorder %v614_v18, 0.0  ;;  %v1180_v26 = vld [vmem:[%s1758_s1 + $0xe] ss:$0 sm:$0xff] }
  0xb5   : > { %v603_v33 = vadd.f32 %v1156_v23, %v596_v27  ;;  %v658_v35 = vpop.permute.xlu1 %657  ;;  %v636_v36 = vpop.permute.xlu0 %635  ;;  %v520_v38 = vadd.f32 %v519_v31, %v498_v28 }
  0xb6   : > { %v662_v39 = vmul.f32 %v1601_v48, %v658_v35  ;;  %v626_v42 = vadd.f32 %v1614_v55, %v625_v29  ;;  %v640_v44 = vmul.f32 %v1601_v48, %v636_v36  ;;  %v563_v47 = vsel %vm562_vm5, %v561_v32, 0.0 }
  0xb7   : > { %v604_v43 = vadd.f32 %v1614_v55, %v603_v33  ;;  %v542_v45 = vadd.f32 %v541_v37, %v520_v38  ;;  %v585_v59 = vsel %vm584_vm6, %v583_v41, 0.0  ;;  %vm650_vm9 = vcmp.ne.f32.partialorder %v636_v36, 0.0 }
  0xb8   : > { %v669_v46 = vadd.f32 %v1165_v34, %v662_v39  ;;  %v647_v50 = vadd.f32 %v1162_v40, %v640_v44  ;;  %v627_v60 = vmax.f32 %v626_v42, 0.0  ;;  %vm672_vm10 = vcmp.ne.f32.partialorder %v658_v35, 0.0 }
  0xb9   : > { %v605_v49 = vmax.f32 %v604_v43, 0.0  ;;  %v702_v52 = vpop.permute.xlu1 %701  ;;  %v680_v53 = vpop.permute.xlu0 %679  ;;  %v564_v54 = vadd.f32 %v563_v47, %v542_v45 }
  0xba   : > { %v670_v56 = vadd.f32 %v1614_v55, %v669_v46  ;;  %v706_v57 = vmul.f32 %v1601_v48, %v702_v52  ;;  %v648_v61 = vadd.f32 %v1614_v55, %v647_v50  ;;  %v684_v62 = vmul.f32 %v1601_v48, %v680_v53 }
  0xbb   : > { %v586_v63 = vadd.f32 %v585_v59, %v564_v54  ;;  %v607_v1 = vsel %vm606_vm7, %v605_v49, 0.0  ;;  %v629_v11 = vsel %vm628_vm8, %v627_v60, 0.0  ;;  %vm694_vm11 = vcmp.ne.f32.partialorder %v680_v53, 0.0 }
  0xbc   : > { %v713_v0 = vadd.f32 %v1171_v51, %v706_v57  ;;  %v649_v2 = vmax.f32 %v648_v61, 0.0  ;;  %v691_v3 = vadd.f32 %v1168_v58, %v684_v62  ;;  %v671_v8 = vmax.f32 %v670_v56, 0.0  ;;  %v1322_v56 = vld [vmem:[%s1764_s7 + $0x30] sm:$0xff]   ;;  %v1323_v57 = vld [vmem:[%s1764_s7 + $0x38] sm:$0xff]   ;;  %v1184_v58 = vld [vmem:[%s1763_s6] ss:$0 sm:$0xff] }
  0xbd   : > { %v746_v5 = vpop.permute.xlu1 %745  ;;  %v724_v6 = vpop.permute.xlu0 %723  ;;  %v608_v7 = vadd.f32 %v607_v1, %v586_v63  ;;  %vm716_vm12 = vcmp.ne.f32.partialorder %v702_v52, 0.0  ;;  %1257 = vmatpush3.bf16.msra.mxu1 %v1322_v56 }
  0xbe   : > { %v750_v9 = vmul.f32 %v1601_v48, %v746_v5  ;;  %v714_v12 = vadd.f32 %v1614_v55, %v713_v0  ;;  %v692_v13 = vadd.f32 %v1614_v55, %v691_v3  ;;  %v728_v14 = vmul.f32 %v1601_v48, %v724_v6  ;;  %1258 = vmatprep.subr.bf16.mxu1 %v1389_v30  ;;  %v1193_v30 = vld [vmem:[%s1765_s8] ss:$0 sm:$0xff] }
  0xbf   : > { %v630_v15 = vadd.f32 %v629_v11, %v608_v7  ;;  %v651_v17 = vsel %vm650_vm9, %v649_v2, 0.0  ;;  %v673_v23 = vsel %vm672_vm10, %v671_v8, 0.0  ;;  %vm738_vm13 = vcmp.ne.f32.partialorder %v724_v6, 0.0 }
  0xc0   : > { %v757_v16 = vadd.f32 %v1177_v4, %v750_v9  ;;  %v693_v18 = vmax.f32 %v692_v13, 0.0  ;;  %v735_v19 = vadd.f32 %v1174_v10, %v728_v14  ;;  %v715_v27 = vmax.f32 %v714_v12, 0.0 }
  0xc1   : > { %v790_v21 = vpop.permute.xlu1 %789  ;;  %v768_v22 = vpop.permute.xlu0 %767  ;;  %v652_v24 = vadd.f32 %v651_v17, %v630_v15  ;;  %vm760_vm14 = vcmp.ne.f32.partialorder %v746_v5, 0.0  ;;  %1259 = vmatpush3.bf16.msra.mxu1 %v1323_v57 }
  0xc2   : > { %v794_v25 = vmul.f32 %v1601_v48, %v790_v21  ;;  %v758_v28 = vadd.f32 %v1614_v55, %v757_v16  ;;  %v736_v29 = vadd.f32 %v1614_v55, %v735_v19  ;;  %v772_v31 = vmul.f32 %v1601_v48, %v768_v22 }
  0xc3   : > { %v674_v32 = vadd.f32 %v673_v23, %v652_v24  ;;  %v695_v34 = vsel %vm694_vm11, %v693_v18, 0.0  ;;  %v717_v38 = vsel %vm716_vm12, %v715_v27, 0.0  ;;  %vm782_vm15 = vcmp.ne.f32.partialorder %v768_v22, 0.0 }
  0xc4   : > { %v801_v33 = vadd.f32 %v1183_v20, %v794_v25  ;;  %v737_v35 = vmax.f32 %v736_v29, 0.0  ;;  %v779_v36 = vadd.f32 %v1180_v26, %v772_v31  ;;  %v759_v39 = vmax.f32 %v758_v28, 0.0 }
  0xc5   : > { %v696_v37 = vadd.f32 %v695_v34, %v674_v32  ;;  %vm804_vm0 = vcmp.ne.f32.partialorder %v790_v21, 0.0 }
  0xc6   : > { %v802_v40 = vadd.f32 %v1614_v55, %v801_v33  ;;  %v780_v41 = vadd.f32 %v1614_v55, %v779_v36  ;;  %v739_v43 = vsel %vm738_vm13, %v737_v35, 0.0  ;;  %v761_v45 = vsel %vm760_vm14, %v759_v39, 0.0  ;;  %v807_v55 = vld [vmem:[%s441_s21] sm:$0xff]  ;;  %s437_s21 = scalar_lea.vmem [#allocation3], %s1134_s29  ;;  %s1328_s29 = sshll.u32 %s1391_s27, 4  ;;  %s1329_s29 = int_to_ptr.vmem [resolvable:$false] %s1328_s29 }
  0xc7   : > { %v718_v42 = vadd.f32 %v717_v38, %v696_v37  ;;  %s1050_s22 = sshll.u32 %s437_s21, 4  ;;  %s1330_s14 = scalar_lea.vmem %s1329_s29, 256  ;;  %s1715_s22 = int_to_ptr.vmem [resolvable:$true] %s1050_s22 }
  0xc8   : > { %v781_v48 = vmax.f32 %v780_v41, 0.0  ;;  %v803_v46 = vmax.f32 %v802_v40, 0.0  ;;  %s1324_s13 = scalar_lea.vmem %s1715_s22, 128  ;;  %p1331_p3 = scmp.lt.s32.totalorder %s1715_s22, %s1329_s29 }
  0xc9   : > { %v740_v44 = vadd.f32 %v739_v43, %v718_v42  ;;  %p1325_p0 = scmp.ne.s32.totalorder %s1715_s22, %s1324_s13  ;;  %p1332_p4 = scmp.lt.s32.totalorder %s1330_s14, %s1324_s13 }
  0xca   : > { %v783_v49 = vsel %vm782_vm15, %v781_v48, 0.0  ;;  %v805_v51 = vsel %vm804_vm0, %v803_v46, 0.0 }
  0xcb   : > { %v762_v47 = vadd.f32 %v761_v45, %v740_v44  ;;  %p1326_p1 = pnand %p1325_p0, %p1481_p6  ;;  %p1333_p5 = por %p1332_p4, %p1331_p3 }
  0xcd   : > { %v784_v50 = vadd.f32 %v783_v49, %v762_v47  ;;  %p1327_p2 = pneg %p1326_p1 }
  0xcf   : > { %v806_v52 = vadd.f32 %v805_v51, %v784_v50  ;;  %p1334_p7 = pnand %p1333_p5, %p1327_p2 }
  0xd1   : > { %v808_v53 = vadd.f32 %v807_v55, %v806_v52 }
  0xd3   : > { %v809_v54 = vpack.c.bf16 %v808_v53, %v808_v53 }
  0xd5   : > { %1241 = vmatmul.mubr.bf16.vlgmr.msra.gmra.mrb[0].mxu0 %v809_v54 }
 0x1a8   : > { %v915_v59 = vpop.f32.mrb[0].mxu0 }
 0x1a9   : > { %v916_v60 = vadd.f32 %v1184_v58, %v915_v59  ;;  %v1242_v61 = vpop.f32.mrb[1].mxu0 }
 0x1aa   : > { %v918_v62 = vpop.f32.mrb[2].mxu0 }
 0x1ab   : > { %v921_v63 = vmax.f32 %v916_v60, 0.0  ;;  %v1243_v0 = vpop.f32.mrb[3].mxu0 }
 0x1ad   : > { %v922_v1 = vpack.c.bf16 %v921_v63, %v921_v63 }
 0x1af   : > { %1261 = vmatmul.mubr.bf16.vlgmr.msra.gmra.mrb[0].mxu1 %v922_v1 }
 0x282   : > { %v1028_v2 = vpop.f32.mrb[0].mxu1 }
 0x283   : > { %v1029_v3 = vadd.f32 %v1193_v30, %v1028_v2  ;;  %v1262_v4 = vpop.f32.mrb[1].mxu1 }
 0x284   : > { %v1031_v5 = vpop.f32.mrb[2].mxu1 }
 0x285   : > { %v1034_v6 = vmax.f32 %v1029_v3, 0.0  ;;  %v1263_v7 = vpop.f32.mrb[3].mxu1 }
 0x287   : > { %1035 = vst [vmem:[%s437_s21] sm:$0xff] %v1034_v6 }
 0x288   : > { %1337 = shalt.err (!%p1334_p7)
}
 0x289   : > { %s1338_s28 = scalar_lea.hbm %s1713_s25, 128  ;;  %s1342_s21 = scalar_lea.hbm %s1766_s9, 256 }
 0x28a   : > { %p1339_p10 = scmp.ne.s32.totalorder %s1713_s25, %s1338_s28  ;;  %p1343_p13 = scmp.lt.u32.totalorder %s1713_s25, %s1766_s9 }
 0x28b   : > { %p1344_p0 = scmp.lt.u32.totalorder %s1342_s21, %s1338_s28  ;;  %p1346_p2 = scmp.lt.u32.totalorder %s1338_s28, %s1713_s25 }
 0x28c   : > { %p1340_p11 = pnand %p1339_p10, %p1481_p6 }
 0x28d   : > { %p1345_p1 = por %p1344_p0, %p1343_p13 }
 0x28e   : > { %p1341_p12 = pneg %p1340_p11 }
 0x28f   : > { %p1347_p3 = por %p1346_p2, %p1345_p1 }
 0x291   : > { %p1348_p4 = pnand %p1347_p3, %p1341_p12 }
 0x293   : > { %1351 = shalt.err (!%p1348_p4)
}
 0x294   : > { %1264 = dma.vmem_to_hbm [thread:$0]  (%p1481_p6), %s1715_s22, 128, %s1713_s25, %s1037_s26  }
 0x295 PF: > { %s1062_s13 = sand.u32 1, %s1374_s30   ;;  %p1267_p5 = pnand %p1129_p9, %p1485_p8 }
 0x296   : > { %s1063_s27 = scalar_lea.sflag [#allocation4], %s1062_s13 }
 0x297   : > { %1369 = dma.done.wait (!%p1267_p5), %s1063_s27, 128  }
 0x298   : > { %1371 = vsyncadd (!%p1267_p5), %s1063_s27, 4294967168  ;;  %p19_p7 = scmp.ge.s32.totalorder %s1467_s15, 4   ;;  %s1769_s30 = smov %s1378_s10 }
 0x299   : > { %s1770_s10 = smov %s1382_s11  ;;  %s1771_s11 = smov %s1479_s18 }
 0x29a   : > { %s1772_s12 = smov %s1467_s15  ;;  %21 = sbr.rel (!%p19_p7) target bundleno = 3 (0x3), region = 167 }
 0x2a1   :  { %1068 = vsyncpa [#allocation4], 1 }
 0x2a2   :  { %1070 = vsyncpa [#allocation4 + $0x1], 1 }

</bundles_post_ra>
